<compile_context>
chip_gen: v7x
topology: tpu7x:2x2x1
jax: 0.10.0
libtpu: 0.0.40
codegen_flags: <defaults>
</compile_context>

<pallas_src>
import functools

import jax
import jax.numpy as jnp
from jax.experimental import pallas as pl
from jax.experimental.pallas import tpu as pltpu

T1, T2, S1, S2 = 0, 1, 2, 3  # stacking order of the four MLPs in the raw params


# --------------------------------------------------------------------------- #
# Kernel
# --------------------------------------------------------------------------- #
def linear_nvp_kernel(xt_ref, trow_ref, w0x_ref, w0t_ref, b0_ref,
                      w1_ref, b1_ref, w2_ref, b2_ref, o_ref,
                      *, dim, num_hidden):
    x_bf = xt_ref[...]                                   # (dim, tb) bf16
    t_row = trow_ref[...]                                # (1, tb)  f32

    # Layer 0: MXU on the x part, exact rank-1 VPU update for the time channel.
    h = jnp.dot(w0x_ref[...], x_bf, preferred_element_type=jnp.float32)
    h = h + w0t_ref[...] * t_row + b0_ref[...]
    h = jnp.maximum(h, 0.0)

    # Fused hidden layers (block-diagonal W1 per layer), unrolled statically.
    for l in range(num_hidden):
        h = jnp.dot(w1_ref[l], h.astype(jnp.bfloat16),
                    preferred_element_type=jnp.float32) + b1_ref[l]
        h = jnp.maximum(h, 0.0)

    # Fused output layer: rows ordered [t2|t1|s2|s1], each block of width d/2.
    y = jnp.dot(w2_ref[...], h.astype(jnp.bfloat16),
                preferred_element_type=jnp.float32) + b2_ref[...]

    x_f32 = x_bf.astype(jnp.float32)                     # (dim, tb)
    out = x_f32 * y[dim:, :] + y[:dim, :]                # x * s(.,t) + t(.,t)
    o_ref[...] = out.astype(o_ref.dtype)                 # lane-dense full store


# --------------------------------------------------------------------------- #
# Wrapper (transposed layout; transpose once at the model boundary)
# --------------------------------------------------------------------------- #
def _pick_batch_tile(b_padded, *, vmem_budget_bytes=40 << 20, bytes_per_elt=1200):
    """Largest lane-aligned batch tile under the VMEM budget; prefer exactly
    >= 2 grid steps so v7x's two TensorCores both get work (neutral on v5e/v6e)."""
    assert b_padded % 128 == 0
    max_by_vmem = max(128, (vmem_budget_bytes // bytes_per_elt) // 128 * 128)
    target = b_padded // 2 if b_padded >= 256 else b_padded
    tb = max(128, (min(target, max_by_vmem) // 128) * 128)
    while b_padded % tb != 0:
        tb -= 128
    return tb


def _pad_lanes(a, b_padded):
    b = a.shape[1]
    return a if b == b_padded else jnp.pad(a, ((0, 0), (0, b_padded - b)))


def linear_nvp_forward_t(x_t, t_row, fused, *, batch_tile=None):
    """x_t: (dim, B), t_row: (1, B)  ->  out^T: (dim, B) in bf16."""
    dim, B = x_t.shape
    num_hidden, H4, _ = fused["w1"].shape
    b_padded = ((B + 127) // 128) * 128
    tb = _pick_batch_tile(b_padded) if batch_tile is None else batch_tile
    assert b_padded % tb == 0, "padded batch must be divisible by the batch tile"

    x_t_bf = _pad_lanes(x_t.astype(jnp.bfloat16), b_padded)
    t_row_f = _pad_lanes(t_row.astype(jnp.float32), b_padded)

    # VMEM estimate: double-buffered bf16 I/O + 2 live f32 (4H, tb) intermediates.
    per_elt = 2 * (2 * dim * 2) + 2 * 4 + 2 * H4 * 4
    weights = 2 * (H4 * dim * 2 + num_hidden * H4 * H4 * 2 + 2 * dim * H4 * 2
                   + (3 * H4 + num_hidden * H4 + 2 * dim) * 4)
    vmem_est = weights + tb * per_elt + (2 << 20)
    cp_kwargs = {"dimension_semantics": ("parallel",)}
    if vmem_est > (12 << 20):
        cp_kwargs["vmem_limit_bytes"] = min(int(vmem_est * 1.5), 48 << 20)

    out_t = pl.pallas_call(
        functools.partial(linear_nvp_kernel, dim=dim, num_hidden=num_hidden),
        out_shape=jax.ShapeDtypeStruct((dim, b_padded), jnp.bfloat16),
        grid_spec=pltpu.PrefetchScalarGridSpec(
            num_scalar_prefetch=0,
            grid=(b_padded // tb,),
            in_specs=[
                pl.BlockSpec((dim, tb), lambda i: (0, i)),                 # x^T tile (bf16)
                pl.BlockSpec((1, tb), lambda i: (0, i)),                   # t row   (f32)
                pl.BlockSpec((H4, dim), lambda i: (0, 0)),                 # W0x (bf16)
                pl.BlockSpec((H4, 1), lambda i: (0, 0)),                   # w0t (f32)
                pl.BlockSpec((H4, 1), lambda i: (0, 0)),                   # b0  (f32)
                pl.BlockSpec((num_hidden, H4, H4), lambda i: (0, 0, 0)),   # W1  (bf16)
                pl.BlockSpec((num_hidden, H4, 1), lambda i: (0, 0, 0)),    # b1  (f32)
                pl.BlockSpec((2 * dim, H4), lambda i: (0, 0)),             # W2  (bf16)
                pl.BlockSpec((2 * dim, 1), lambda i: (0, 0)),              # b2  (f32)
            ],
            out_specs=pl.BlockSpec((dim, tb), lambda i: (0, i)),
        ),
        compiler_params=pltpu.CompilerParams(**cp_kwargs),
    )(x_t_bf, t_row_f, fused["w0x"], fused["w0t"], fused["b0"],
      fused["w1"], fused["b1"], fused["w2"], fused["b2"])

    return out_t if b_padded == B else out_t[:, :B]


def linear_nvp_forward(x, t, fused, *, batch_tile=None):
    """Row-major convenience wrapper: transposes once at the model boundary."""
    out_t = linear_nvp_forward_t(x.T, t.T, fused, batch_tile=batch_tile)
    return out_t.T


# --------------------------------------------------------------------------- #
# Parameter construction (PyTorch Linear layout) and 4-way fusion
# --------------------------------------------------------------------------- #
def init_params(key, dim, hidden_dim, hidden_layer_number=2):
    """PyTorch-Linear-style init, stacked for [t1, t2, s1, s2], weights (out, in)."""
    # TODO(synk): `hidden_layer_number` is an undefined global in the PyTorch
    # source; default 2 (one Linear(H,H)+ReLU block) -- parametrized here.
    d2 = dim // 2
    H = hidden_dim
    num_hidden = hidden_layer_number - 1

    def uni(k, shape, fan_in):
        bound = 1.0 / jnp.sqrt(jnp.float32(fan_in))
        return jax.random.uniform(k, shape, jnp.float32, -bound, bound)

    ks = jax.random.split(key, 6)
    return {
        "w0": uni(ks[0], (4, H, d2 + 1), d2 + 1),
        "b0": uni(ks[1], (4, H), d2 + 1),
        "w1": uni(ks[2], (num_hidden, 4, H, H), H),
        "b1": uni(ks[3], (num_hidden, 4, H), H),
        "w2": uni(ks[4], (4, d2, H), H),
        "b2": uni(ks[5], (4, d2), H),
    }


def fuse_params(p, dim):
    """Build the block-fused weights consumed by the kernel (host side, once).
    Matmul operands in bf16, biases / rank-1 time column in f32."""
    d2 = dim // 2
    H = p["w0"].shape[1]
    num_hidden = p["w1"].shape[0]
    f32, bf16 = jnp.float32, jnp.bfloat16
    uses_xa = (True, False, True, False)      # t1/s1 read xa, t2/s2 read xb

    w0x = jnp.zeros((4 * H, dim), f32)
    w0t = jnp.zeros((4 * H, 1), f32)
    for idx in range(4):
        r = idx * H
        w0 = p["w0"][idx]                     # (H, d2+1): x cols 0:d2, t col d2
        c0 = 0 if uses_xa[idx] else d2
        w0x = w0x.at[r:r + H, c0:c0 + d2].set(w0[:, :d2])
        w0t = w0t.at[r:r + H, 0].set(w0[:, d2])
    b0 = p["b0"].reshape(4 * H, 1).astype(f32)

    w1 = jnp.stack([
        jax.scipy.linalg.block_diag(*[p["w1"][l, i] for i in range(4)])
        for l in range(num_hidden)
    ]).astype(bf16)                                            # (L, 4H, 4H)
    b1 = p["b1"].reshape(num_hidden, 4 * H, 1).astype(f32)

    out_order = (T2, T1, S2, S1)              # => y rows = [t2|t1|s2|s1]
    w2 = jnp.zeros((4 * d2, 4 * H), f32)
    b2 = jnp.zeros((4 * d2, 1), f32)
    for k, idx in enumerate(out_order):
        w2 = w2.at[k * d2:(k + 1) * d2, idx * H:(idx + 1) * H].set(p["w2"][idx])
        b2 = b2.at[k * d2:(k + 1) * d2, 0].set(p["b2"][idx])

    return {"w0x": w0x.astype(bf16), "w0t": w0t, "b0": b0,
            "w1": w1, "b1": b1, "w2": w2.astype(bf16), "b2": b2}


# --------------------------------------------------------------------------- #
# Pure-JAX reference (un-fused, mirrors the PyTorch module)
# --------------------------------------------------------------------------- #
def ref_forward(x, t, p):
    d2 = x.shape[1] // 2
    num_hidden = p["w1"].shape[0]

    def mlp(inp, idx):
        h = jnp.concatenate([inp, t], axis=1)
        h = jnp.maximum(h @ p["w0"][idx].T + p["b0"][idx], 0.0)
        for l in range(num_hidden):
            h = jnp.maximum(h @ p["w1"][l, idx].T + p["b1"][l, idx], 0.0)
        return h @ p["w2"][idx].T + p["b2"][idx]

    xa, xb = x[:, :d2], x[:, d2:]
    out_a = xa * mlp(xb, S2) + mlp(xb, T2)
    out_b = xb * mlp(xa, S1) + mlp(xa, T1)
    return jnp.concatenate([out_a, out_b], axis=1)


if __name__ == "__main__":
    dim = 8                   # self.dim ; dim // 2 = 4
    hidden_dim_s = 32         # 4*H = 128 -> one MXU lane tile after fusion
    hidden_layer_number = 2   # default depth of FlowMLP (one hidden block)
    batch = 256               # -> tb = 128, grid = 2 (pipelined, v7x dual-TC)

    key = jax.random.PRNGKey(0)
    kp, kx, kt = jax.random.split(key, 3)
    params = init_params(kp, dim, hidden_dim_s, hidden_layer_number)
    fused = fuse_params(params, dim)

    x = jax.random.normal(kx, (batch, dim), jnp.float32)
    t = jax.random.uniform(kt, (batch, 1), jnp.float32)

    # Transpose once at the model boundary; the kernel stays in (dim, B) layout.
    out_t = linear_nvp_forward_t(x.T, t.T, fused)
    out_t = jax.block_until_ready(out_t)
    out = out_t.T.astype(jnp.float32)

    ref = ref_forward(x, t, params)
    assert out.shape == (batch, dim)
    # bf16 matmul operands / I/O with f32 accumulation -> loosened tolerance.
    assert jnp.allclose(out, ref, rtol=5e-2, atol=2e-2), "mismatch vs JAX reference"

    print("KERNEL_OK")
</pallas_src>

<mosaic_0001>
module attributes {stable_mosaic.version = 11 : i64} {
  func.func @linear_nvp_kernel(%arg0: i32, %arg1: memref<8x128xbf16, #tpu.memory_space<vmem>>, %arg2: memref<1x128xf32, #tpu.memory_space<vmem>>, %arg3: memref<128x8xbf16, #tpu.memory_space<vmem>>, %arg4: memref<128x1xf32, #tpu.memory_space<vmem>>, %arg5: memref<128x1xf32, #tpu.memory_space<vmem>>, %arg6: memref<1x128x128xbf16, #tpu.memory_space<vmem>>, %arg7: memref<1x128x1xf32, #tpu.memory_space<vmem>>, %arg8: memref<16x128xbf16, #tpu.memory_space<vmem>>, %arg9: memref<16x1xf32, #tpu.memory_space<vmem>>, %arg10: memref<8x128xbf16, #tpu.memory_space<vmem>>) attributes {dimension_semantics = [#tpu.dimension_semantics<parallel>], iteration_bounds = array<i64: 2>, scalar_prefetch = 0 : i64, scratch_operands = 0 : i64, tpu.core_type = #tpu.core_type<tc>, window_params = [{transform_indices = @transform_0, window_bounds = array<i64: 8, 128>}, {transform_indices = @transform_1, window_bounds = array<i64: 1, 128>}, {pipeline_mode = #tpu.pipeline_mode<synchronous>, transform_indices = @transform_2, window_bounds = array<i64: 128, 8>}, {pipeline_mode = #tpu.pipeline_mode<synchronous>, transform_indices = @transform_3, window_bounds = array<i64: 128, 1>}, {pipeline_mode = #tpu.pipeline_mode<synchronous>, transform_indices = @transform_4, window_bounds = array<i64: 128, 1>}, {pipeline_mode = #tpu.pipeline_mode<synchronous>, transform_indices = @transform_5, window_bounds = array<i64: 1, 128, 128>}, {pipeline_mode = #tpu.pipeline_mode<synchronous>, transform_indices = @transform_6, window_bounds = array<i64: 1, 128, 1>}, {pipeline_mode = #tpu.pipeline_mode<synchronous>, transform_indices = @transform_7, window_bounds = array<i64: 16, 128>}, {pipeline_mode = #tpu.pipeline_mode<synchronous>, transform_indices = @transform_8, window_bounds = array<i64: 16, 1>}, {transform_indices = @transform_9, window_bounds = array<i64: 8, 128>}]} {
    %c0 = arith.constant 0 : index
    %c0_0 = arith.constant 0 : index
    %0 = vector.load %arg1[%c0, %c0_0] : memref<8x128xbf16, #tpu.memory_space<vmem>>, vector<8x128xbf16>
    %c0_1 = arith.constant 0 : index
    %c0_2 = arith.constant 0 : index
    %1 = vector.load %arg2[%c0_1, %c0_2] : memref<1x128xf32, #tpu.memory_space<vmem>>, vector<1x128xf32>
    %c0_3 = arith.constant 0 : index
    %c0_4 = arith.constant 0 : index
    %2 = vector.load %arg3[%c0_3, %c0_4] : memref<128x8xbf16, #tpu.memory_space<vmem>>, vector<128x8xbf16>
    %cst = arith.constant dense<0.000000e+00> : vector<128x128xf32>
    %3 = tpu.matmul %2, %0, %cst {dimension_numbers = #tpu.dot_dimension_numbers<[1], [0], [0], [1], [0, 0, 1, 1], [], []>} : vector<128x8xbf16>, vector<8x128xbf16>, vector<128x128xf32> -> vector<128x128xf32>
    %c0_5 = arith.constant 0 : index
    %c0_6 = arith.constant 0 : index
    %4 = vector.load %arg4[%c0_5, %c0_6] : memref<128x1xf32, #tpu.memory_space<vmem>>, vector<128x1xf32>
    %5 = vector.broadcast %4 : vector<128x1xf32> to vector<128x128xf32>
    %6 = vector.broadcast %1 : vector<1x128xf32> to vector<128x128xf32>
    %7 = arith.mulf %5, %6 : vector<128x128xf32>
    %8 = arith.addf %3, %7 : vector<128x128xf32>
    %c0_7 = arith.constant 0 : index
    %c0_8 = arith.constant 0 : index
    %9 = vector.load %arg5[%c0_7, %c0_8] : memref<128x1xf32, #tpu.memory_space<vmem>>, vector<128x1xf32>
    %10 = vector.broadcast %9 : vector<128x1xf32> to vector<128x128xf32>
    %11 = arith.addf %8, %10 : vector<128x128xf32>
    %cst_9 = arith.constant 0.000000e+00 : f32
    %12 = vector.broadcast %cst_9 : f32 to vector<128x128xf32>
    %13 = arith.maximumf %11, %12 : vector<128x128xf32>
    %c0_10 = arith.constant 0 : index
    %c0_11 = arith.constant 0 : index
    %c0_12 = arith.constant 0 : index
    %14 = vector.load %arg6[%c0_10, %c0_11, %c0_12] : memref<1x128x128xbf16, #tpu.memory_space<vmem>>, vector<1x128x128xbf16>
    %15 = vector.shape_cast %14 : vector<1x128x128xbf16> to vector<128x128xbf16>
    %16 = arith.truncf %13 : vector<128x128xf32> to vector<128x128xbf16>
    %cst_13 = arith.constant dense<0.000000e+00> : vector<128x128xf32>
    %17 = tpu.matmul %15, %16, %cst_13 {dimension_numbers = #tpu.dot_dimension_numbers<[1], [0], [0], [1], [0, 0, 1, 1], [], []>} : vector<128x128xbf16>, vector<128x128xbf16>, vector<128x128xf32> -> vector<128x128xf32>
    %c0_14 = arith.constant 0 : index
    %c0_15 = arith.constant 0 : index
    %c0_16 = arith.constant 0 : index
    %18 = vector.load %arg7[%c0_14, %c0_15, %c0_16] : memref<1x128x1xf32, #tpu.memory_space<vmem>>, vector<1x128x1xf32>
    %19 = vector.shape_cast %18 : vector<1x128x1xf32> to vector<128x1xf32>
    %20 = vector.broadcast %19 : vector<128x1xf32> to vector<128x128xf32>
    %21 = arith.addf %17, %20 : vector<128x128xf32>
    %cst_17 = arith.constant 0.000000e+00 : f32
    %22 = vector.broadcast %cst_17 : f32 to vector<128x128xf32>
    %23 = arith.maximumf %21, %22 : vector<128x128xf32>
    %c0_18 = arith.constant 0 : index
    %c0_19 = arith.constant 0 : index
    %24 = vector.load %arg8[%c0_18, %c0_19] : memref<16x128xbf16, #tpu.memory_space<vmem>>, vector<16x128xbf16>
    %25 = arith.truncf %23 : vector<128x128xf32> to vector<128x128xbf16>
    %cst_20 = arith.constant dense<0.000000e+00> : vector<16x128xf32>
    %26 = tpu.matmul %24, %25, %cst_20 {dimension_numbers = #tpu.dot_dimension_numbers<[1], [0], [0], [1], [0, 0, 1, 1], [], []>} : vector<16x128xbf16>, vector<128x128xbf16>, vector<16x128xf32> -> vector<16x128xf32>
    %c0_21 = arith.constant 0 : index
    %c0_22 = arith.constant 0 : index
    %27 = vector.load %arg9[%c0_21, %c0_22] : memref<16x1xf32, #tpu.memory_space<vmem>>, vector<16x1xf32>
    %28 = vector.broadcast %27 : vector<16x1xf32> to vector<16x128xf32>
    %29 = arith.addf %26, %28 : vector<16x128xf32>
    %30 = arith.extf %0 : vector<8x128xbf16> to vector<8x128xf32>
    %31 = vector.extract_strided_slice %29 {offsets = [8, 0], sizes = [8, 128], strides = [1, 1]} : vector<16x128xf32> to vector<8x128xf32>
    %32 = arith.mulf %30, %31 : vector<8x128xf32>
    %33 = vector.extract_strided_slice %29 {offsets = [0, 0], sizes = [8, 128], strides = [1, 1]} : vector<16x128xf32> to vector<8x128xf32>
    %34 = arith.addf %32, %33 : vector<8x128xf32>
    %35 = arith.truncf %34 : vector<8x128xf32> to vector<8x128xbf16>
    %c0_23 = arith.constant 0 : index
    %c0_24 = arith.constant 0 : index
    %36 = vector.load %arg10[%c0_23, %c0_24] : memref<8x128xbf16, #tpu.memory_space<vmem>>, vector<8x128xbf16>
    tpu.vector_store %arg10[%c0_23, %c0_24], %35 {strides = array<i32>} : memref<8x128xbf16, #tpu.memory_space<vmem>>, vector<8x128xbf16>,
    return
  }
  func.func @transform_0(%arg0: i32) -> (i32, i32) {
    %c0_i32 = arith.constant 0 : i32
    %c0_i32_0 = arith.constant 0 : i32
    return %c0_i32, %arg0 : i32, i32
  }
  func.func @transform_1(%arg0: i32) -> (i32, i32) {
    %c0_i32 = arith.constant 0 : i32
    %c0_i32_0 = arith.constant 0 : i32
    return %c0_i32, %arg0 : i32, i32
  }
  func.func @transform_2(%arg0: i32) -> (i32, i32) {
    %c0_i32 = arith.constant 0 : i32
    %c0_i32_0 = arith.constant 0 : i32
    %c0_i32_1 = arith.constant 0 : i32
    return %c0_i32, %c0_i32_0 : i32, i32
  }
  func.func @transform_3(%arg0: i32) -> (i32, i32) {
    %c0_i32 = arith.constant 0 : i32
    %c0_i32_0 = arith.constant 0 : i32
    %c0_i32_1 = arith.constant 0 : i32
    return %c0_i32, %c0_i32_0 : i32, i32
  }
  func.func @transform_4(%arg0: i32) -> (i32, i32) {
    %c0_i32 = arith.constant 0 : i32
    %c0_i32_0 = arith.constant 0 : i32
    %c0_i32_1 = arith.constant 0 : i32
    return %c0_i32, %c0_i32_0 : i32, i32
  }
  func.func @transform_5(%arg0: i32) -> (i32, i32, i32) {
    %c0_i32 = arith.constant 0 : i32
    %c0_i32_0 = arith.constant 0 : i32
    %c0_i32_1 = arith.constant 0 : i32
    %c0_i32_2 = arith.constant 0 : i32
    return %c0_i32, %c0_i32_0, %c0_i32_1 : i32, i32, i32
  }
  func.func @transform_6(%arg0: i32) -> (i32, i32, i32) {
    %c0_i32 = arith.constant 0 : i32
    %c0_i32_0 = arith.constant 0 : i32
    %c0_i32_1 = arith.constant 0 : i32
    %c0_i32_2 = arith.constant 0 : i32
    return %c0_i32, %c0_i32_0, %c0_i32_1 : i32, i32, i32
  }
  func.func @transform_7(%arg0: i32) -> (i32, i32) {
    %c0_i32 = arith.constant 0 : i32
    %c0_i32_0 = arith.constant 0 : i32
    %c0_i32_1 = arith.constant 0 : i32
    return %c0_i32, %c0_i32_0 : i32, i32
  }
  func.func @transform_8(%arg0: i32) -> (i32, i32) {
    %c0_i32 = arith.constant 0 : i32
    %c0_i32_0 = arith.constant 0 : i32
    %c0_i32_1 = arith.constant 0 : i32
    return %c0_i32, %c0_i32_0 : i32, i32
  }
  func.func @transform_9(%arg0: i32) -> (i32, i32) {
    %c0_i32 = arith.constant 0 : i32
    %c0_i32_0 = arith.constant 0 : i32
    return %c0_i32, %arg0 : i32, i32
  }
}

</mosaic_0001>

<bundles_post_ra>
// kernel: tpu_custom_call.1
= control target key start
LH: loop header
LB: loop body
LE: loop exit
PB: predicated region body
PF: predicated region fallthrough
CT: control target
= control target key end

     0   :  { %s1893_s0 = inlined_call_operand.vmem [shape: bf16[8,256], index: 0, kind: input, shape index: {}]   ;;  %s1894_s1 = inlined_call_operand.vmem [shape: f32[1,256], index: 1, kind: input, shape index: {}]   ;;  %s1895_s2 = inlined_call_operand.vmem [shape: bf16[128,8], index: 2, kind: input, shape index: {}]   ;;  %s1896_s3 = inlined_call_operand.vmem [shape: f32[128,1], index: 3, kind: input, shape index: {}]   ;;  %s1897_s4 = inlined_call_operand.vmem [shape: f32[128,1], index: 4, kind: input, shape index: {}]   ;;  %s1898_s5 = inlined_call_operand.vmem [shape: bf16[1,128,128], index: 5, kind: input, shape index: {}]   ;;  %s1899_s6 = inlined_call_operand.vmem [shape: f32[1,128,1], index: 6, kind: input, shape index: {}]   ;;  %s1900_s7 = inlined_call_operand.vmem [shape: bf16[16,128], index: 7, kind: input, shape index: {}]   ;;  %s1901_s8 = inlined_call_operand.vmem [shape: f32[16,1], index: 8, kind: input, shape index: {}]   ;;  %s1902_s9 = inlined_call_operand.hbm [shape: bf16[8,256], index: 9, kind: output, shape index: {}]  }
   0x1   :  { %1903 = sst [smem:[#allocation5_spill]] %s1893_s0 }
   0x2   :  { %14 = vsyncpa [#allocation3], 0 }
   0x3   :  { %16 = vsyncpa [#allocation3 + $0x1], 0  ;;  %s1530_s30 = smov 0   ;;  %s1532_s10 = smov 0  }
   0x4   :  { %s1534_s11 = smov 0   ;;  %s1536_s12 = smov 0  }
   0x5 LB: > { %s1551_s13 = sadd.s32 4294967295, %s1474_s12   ;;  %s1210_s14 = sadd.s32 4294967294, %s1474_s12   ;;  %s1474_s12 = sphi %s1536_s12, %s1910_s12   ;;  %s1470_s11 = sphi %s1534_s11, %s1909_s11   ;;  %s1466_s10 = sphi %s1532_s10, %s1908_s10   ;;  %s1462_s30 = sphi %s1530_s30, %s1907_s30  }
   0x6   : > { %s1555_s15 = sadd.s32 1, %s1474_s12   ;;  %s228_s16 = sadd.s32 1, %s1470_s11 }
   0x7   : > { %s225_s17 = ssub.s32 %s1474_s12, %s1555_s15  ;;  %p238_p0 = scmp.ne.s32.totalorder %s1470_s11, %s1466_s10 }
   0x8   : > { %p226_p1 = scmp.eq.s32.totalorder %s225_s17, 0  ;;  %p239_p2 = scmp.eq.s32.totalorder %s1551_s13, 1 }
   0x9   : > { %p244_p3 = scmp.ne.s32.totalorder %s1466_s10, %s1462_s30  ;;  %p245_p4 = scmp.eq.s32.totalorder %s1210_s14, 1 }
   0xa   : > { %s1566_s18 = scalar_select %p226_p1, %s1470_s11, %s228_s16  }
   0xb   : > { %p1568_p5 = por %p239_p2, %p238_p0  ;;  %p1572_p6 = por %p245_p4, %p244_p3 }
   0xc   : > { %p1213_p7 = scmp.ge.s32.totalorder %s1474_s12, 1  ;;  %p297_p8 = scmp.lt.s32.totalorder %s1474_s12, 3 }
   0xe   : > { %p298_p9 = pnand %p1213_p7, %p297_p8 }
   0xf   : > { %v363_v0 = vld [vmem:[%s1896_s3 + $0x10] sm:$0xff] (!%p298_p9)  ;;  %v361_v1 = vld [vmem:[%s1896_s3] sm:$0xff] (!%p298_p9)  ;;  %p335_p10 = scmp.lt.s32.totalorder (!%p298_p9), %s1551_s13, 1  ;;  %v1476_v2 = vmov (!%p298_p9), 0   ;;  %v364_v3 = vld [vmem:[%s1896_s3 + $0x18] sm:$0xff] (!%p298_p9)  ;;  %vm519_vm0 = vcmask (!%p298_p9), 64512  }
  0x10   : > { %301 = sbr.rel (%p298_p9) target bundleno = 775 (0x307), region = 56  ;;  %1394 = vset.pattern.permute.xlu1 (!%p298_p9), %v1476_v2  ;;  %1393 = vset.pattern.permute.xlu0 (!%p298_p9), %v1476_v2  ;;  %v1395_v4 = vld [vmem:[%s1895_s2] sm:$0xff] (!%p298_p9)   ;;  %v362_v5 = vld [vmem:[%s1896_s3 + $0x8] sm:$0xff] (!%p298_p9)  ;;  %vm544_vm1 = vcmask (!%p298_p9), 1043456   ;;  %s1906_s0 = sld [smem:[#allocation5_spill]] (!%p298_p9)  ;;  %v1397_v11 = vld [vmem:[%s1895_s2 + $0x10] sm:$0xff] (!%p298_p9)  }
  0x11   : > { %389 = vperm.xlu1 (!%p298_p9), %1394, %v363_v0   ;;  %379 = vperm.xlu0 (!%p298_p9), %1393, %v361_v1   ;;  %v646_v6 = vld [vmem:[%s1897_s4 + $0x8] sm:$0xff] (!%p298_p9)  ;;  %v645_v8 = vld [vmem:[%s1897_s4] sm:$0xff] (!%p298_p9)  ;;  %v648_v14 = vld [vmem:[%s1897_s4 + $0x18] sm:$0xff] (!%p298_p9)  ;;  %vm1478_vm2 = vmmov (!%p298_p9), 0   ;;  %s1243_s21 = sshll.u32 (!%p298_p9), %s1551_s13, 6 }
  0x12   : > { %1282 = vmatprep.mubr.msk.bf16.mxu0 (!%p298_p9), %vm519_vm0, %v1395_v4  ;;  %v1396_v10 = vld [vmem:[%s1895_s2 + $0x8] sm:$0xff] (!%p298_p9)   ;;  %v365_v13 = vld [vmem:[%s1896_s3 + $0x20] sm:$0xff] (!%p298_p9)  ;;  %v647_v15 = vld [vmem:[%s1897_s4 + $0x10] sm:$0xff] (!%p298_p9)  ;;  %s1851_s26 = scalar_lea.hbm (!%p298_p9), %s1902_s9, %s1243_s21 }
  0x13   : > { %v366_v12 = vld [vmem:[%s1896_s3 + $0x28] sm:$0xff] (!%p298_p9)  ;;  %v1398_v16 = vld [vmem:[%s1895_s2 + $0x18] sm:$0xff] (!%p298_p9)   ;;  %v1399_v17 = vld [vmem:[%s1895_s2 + $0x20] sm:$0xff] (!%p298_p9)  }
  0x14   : > { %v368_v18 = vld [vmem:[%s1896_s3 + $0x38] sm:$0xff] (!%p298_p9)  ;;  %v367_v19 = vld [vmem:[%s1896_s3 + $0x30] sm:$0xff] (!%p298_p9)  ;;  %v650_v20 = vld [vmem:[%s1897_s4 + $0x28] sm:$0xff] (!%p298_p9) }
  0x15   : > { %394 = vperm.xlu1 (!%p298_p9), %1394, %v364_v3   ;;  %384 = vperm.xlu0 (!%p298_p9), %1393, %v362_v5   ;;  %v649_v21 = vld [vmem:[%s1897_s4 + $0x20] sm:$0xff] (!%p298_p9)  ;;  %v1400_v22 = vld [vmem:[%s1895_s2 + $0x28] sm:$0xff] (!%p298_p9)   ;;  %v1401_v23 = vld [vmem:[%s1895_s2 + $0x30] sm:$0xff] (!%p298_p9)  }
  0x16   : > { %v370_v24 = vld [vmem:[%s1896_s3 + $0x48] sm:$0xff] (!%p298_p9)  ;;  %v369_v25 = vld [vmem:[%s1896_s3 + $0x40] sm:$0xff] (!%p298_p9)  ;;  %v652_v26 = vld [vmem:[%s1897_s4 + $0x38] sm:$0xff] (!%p298_p9) }
  0x17   : > { %s1589_s27 = scalar_select %p335_p10, %s1551_s13, 1  ;;  %v651_v27 = vld [vmem:[%s1897_s4 + $0x30] sm:$0xff]  ;;  %v1402_v28 = vld [vmem:[%s1895_s2 + $0x38] sm:$0xff]   ;;  %v654_v31 = vld [vmem:[%s1897_s4 + $0x48] sm:$0xff] }
  0x18   : > { %v372_v29 = vld [vmem:[%s1896_s3 + $0x58] sm:$0xff]  ;;  %v371_v30 = vld [vmem:[%s1896_s3 + $0x50] sm:$0xff]  ;;  %v653_v32 = vld [vmem:[%s1897_s4 + $0x40] sm:$0xff]  ;;  %s1479_s13 = smov [#allocation2]  }
  0x19   : > { %s1215_s17 = sshll.u32 %s1589_s27, 2  ;;  %668 = vperm.xlu1 %1394, %v646_v6   ;;  %663 = vperm.xlu0 %1393, %v645_v8   ;;  %v374_v33 = vld [vmem:[%s1896_s3 + $0x68] sm:$0xff]  ;;  %v373_v34 = vld [vmem:[%s1896_s3 + $0x60] sm:$0xff]  ;;  %v656_v35 = vld [vmem:[%s1897_s4 + $0x58] sm:$0xff]  ;;  %s341_s29 = scalar_lea.vmem %s1894_s1, %s1589_s27 }
  0x1a   : > { %s338_s23 = scalar_lea.vmem %s1906_s0, %s1215_s17  ;;  %v655_v36 = vld [vmem:[%s1897_s4 + $0x50] sm:$0xff]  ;;  %v376_v37 = vld [vmem:[%s1896_s3 + $0x78] sm:$0xff]  ;;  %v658_v39 = vld [vmem:[%s1897_s4 + $0x68] sm:$0xff]  ;;  %s332_s17 = sand.u32 1, %s1466_s10  }
  0x1b   : > { %v1605_v7 = vld [vmem:[%s338_s23] sm:$0xf]  ;;  %v375_v38 = vld [vmem:[%s1896_s3 + $0x70] sm:$0xff]  ;;  %v660_v41 = vld [vmem:[%s1897_s4 + $0x78] sm:$0xff]  ;;  %s1214_s0 = sshll.u32 %s332_s17, 2  ;;  %s1129_s28 = scalar_lea.sflag [#allocation3], %s332_s17 }
  0x1c   : > { %1350 = vmatprep.subr.msk.bf16.mxu0 %vm544_vm1, %v1605_v7  ;;  %v546_v9 = vsel %vm544_vm1, %v1605_v7, 0  ;;  %v657_v40 = vld [vmem:[%s1897_s4 + $0x60] sm:$0xff]  ;;  %v659_v42 = vld [vmem:[%s1897_s4 + $0x70] sm:$0xff]  ;;  %v798_v43 = vld [vmem:[%s1899_s6 + $0x8] sm:$0xff]  ;;  %s334_s22 = scalar_lea.vmem [#allocation2], %s1214_s0  ;;  %s1416_s27 = sshll.u32 %s1479_s13, 4  ;;  %s1417_s27 = int_to_ptr.vmem [resolvable:$false] %s1416_s27 }
  0x1d   : > { %1281 = vmatpush3.bf16.msra.mxu0 %v546_v9  ;;  %404 = vperm.xlu1 %1394, %v366_v12   ;;  %v797_v44 = vld [vmem:[%s1899_s6] sm:$0xff]  ;;  %v800_v45 = vld [vmem:[%s1899_s6 + $0x18] sm:$0xff]  ;;  %v799_v46 = vld [vmem:[%s1899_s6 + $0x10] sm:$0xff]  ;;  %s1142_s23 = sshll.u32 %s334_s22, 4  ;;  %s1418_s14 = scalar_lea.vmem %s1417_s27, 128  ;;  %s1853_s23 = int_to_ptr.vmem [resolvable:$true] %s1142_s23 }
  0x1e   : > { %399 = vperm.xlu0 %1393, %v365_v13   ;;  %v802_v47 = vld [vmem:[%s1899_s6 + $0x28] sm:$0xff]  ;;  %v801_v48 = vld [vmem:[%s1899_s6 + $0x20] sm:$0xff]  ;;  %v804_v49 = vld [vmem:[%s1899_s6 + $0x38] sm:$0xff]  ;;  %p1419_p0 = scmp.lt.s32.totalorder %s1853_s23, %s1417_s27 }
  0x1f   : > { %v803_v50 = vld [vmem:[%s1899_s6 + $0x30] sm:$0xff]  ;;  %v806_v51 = vld [vmem:[%s1899_s6 + $0x48] sm:$0xff]  ;;  %v805_v52 = vld [vmem:[%s1899_s6 + $0x40] sm:$0xff] }
  0x20   : > { %1283 = vmatmul.mubr.msk.bf16.vlgmr.msra.gmra.mrb[0].mxu0 %vm519_vm0, %v1396_v10  ;;  %v808_v53 = vld [vmem:[%s1899_s6 + $0x58] sm:$0xff]  ;;  %v807_v54 = vld [vmem:[%s1899_s6 + $0x50] sm:$0xff]  ;;  %v810_v55 = vld [vmem:[%s1899_s6 + $0x68] sm:$0xff] }
  0x21   : > { %1286 = vmatprep.mubr.msk.bf16.mxu0 %vm519_vm0, %v1397_v11  ;;  %678 = vperm.xlu1 %1394, %v648_v14   ;;  %v809_v56 = vld [vmem:[%s1899_s6 + $0x60] sm:$0xff]  ;;  %v812_v57 = vld [vmem:[%s1899_s6 + $0x78] sm:$0xff]  ;;  %v811_v58 = vld [vmem:[%s1899_s6 + $0x70] sm:$0xff] }
  0x22   : > { %673 = vperm.xlu0 %1393, %v647_v15   ;;  %v1064_v59 = vld [vmem:[%s1901_s8] sm:$0xff]  ;;  %v1065_v60 = vld [vmem:[%s1901_s8 + $0x8] sm:$0xff] }
  0x23   : > { %v1403_v61 = vld [vmem:[%s1898_s5] sm:$0xff]  }
  0x24   : > { %1314 = vmatprep.mubr.bf16.mxu1 %v1403_v61 }
  0x25   : > { %414 = vperm.xlu1 %1394, %v368_v18  }
  0x26   : > { %409 = vperm.xlu0 %1393, %v367_v19   ;;  %v1781_v19 = vld [vmem:[%s341_s29] ss:$0 sm:$0xff]  ;;  %s1412_s29 = scalar_lea.vmem %s1853_s23, 64 }
  0x27   : > { %p1413_p11 = scmp.ne.s32.totalorder %s1853_s23, %s1412_s29  ;;  %p1420_p1 = scmp.lt.s32.totalorder %s1418_s14, %s1412_s29 }
  0x28   : > { %1287 = vmatmul.mubr.msk.bf16.gmra.mrb[4].mxu0 %vm519_vm0, %v1398_v16 }
  0x29   : > { %1290 = vmatprep.mubr.msk.bf16.mxu0 %vm519_vm0, %v1399_v17  ;;  %688 = vperm.xlu1 %1394, %v650_v20   ;;  %p1414_p12 = pnand %p1413_p11, %p1568_p5  ;;  %p1421_p2 = por %p1420_p1, %p1419_p0 }
  0x2a   : > { %683 = vperm.xlu0 %1393, %v649_v21  }
  0x2b   : > { %p1415_p13 = pneg %p1414_p12 }
  0x2d   : > { %424 = vperm.xlu1 %1394, %v370_v24   ;;  %p1422_p3 = pnand %p1421_p2, %p1415_p13 }
  0x2e   : > { %419 = vperm.xlu0 %1393, %v369_v25  }
  0x30   : > { %1291 = vmatmul.mubr.msk.bf16.gmra.mrb[8].mxu0 %vm519_vm0, %v1400_v22 }
  0x31   : > { %1294 = vmatprep.mubr.msk.bf16.mxu0 %vm519_vm0, %v1401_v23  ;;  %698 = vperm.xlu1 %1394, %v652_v26  }
  0x32   : > { %693 = vperm.xlu0 %1393, %v651_v27  }
  0x35   : > { %434 = vperm.xlu1 %1394, %v372_v29  }
  0x36   : > { %429 = vperm.xlu0 %1393, %v371_v30  }
  0x38   : > { %1295 = vmatmul.mubr.msk.bf16.gmra.mrb[12].mxu0 %vm519_vm0, %v1402_v28 }
  0x39   : > { %708 = vperm.xlu1 %1394, %v654_v31  }
  0x3a   : > { %703 = vperm.xlu0 %1393, %v653_v32  }
  0x3d   : > { %444 = vperm.xlu1 %1394, %v374_v33  }
  0x3e   : > { %439 = vperm.xlu0 %1393, %v373_v34  }
  0x41   : > { %718 = vperm.xlu1 %1394, %v656_v35  }
  0x42   : > { %713 = vperm.xlu0 %1393, %v655_v36  }
  0x45   : > { %454 = vperm.xlu1 %1394, %v376_v37  }
  0x46   : > { %449 = vperm.xlu0 %1393, %v375_v38  }
  0x49   : > { %728 = vperm.xlu1 %1394, %v658_v39  }
  0x4a   : > { %723 = vperm.xlu0 %1393, %v657_v40  }
  0x4d   : > { %738 = vperm.xlu1 %1394, %v660_v41  }
  0x4e   : > { %733 = vperm.xlu0 %1393, %v659_v42  }
  0x51   : > { %820 = vperm.xlu1 %1394, %v798_v43  }
  0x52   : > { %815 = vperm.xlu0 %1393, %v797_v44  }
  0x55   : > { %830 = vperm.xlu1 %1394, %v800_v45  }
  0x56   : > { %825 = vperm.xlu0 %1393, %v799_v46  }
  0x59   : > { %840 = vperm.xlu1 %1394, %v802_v47  }
  0x5a   : > { %835 = vperm.xlu0 %1393, %v801_v48  }
  0x5d   : > { %850 = vperm.xlu1 %1394, %v804_v49  }
  0x5e   : > { %845 = vperm.xlu0 %1393, %v803_v50  }
  0x61   : > { %860 = vperm.xlu1 %1394, %v806_v51  }
  0x62   : > { %855 = vperm.xlu0 %1393, %v805_v52  }
  0x65   : > { %870 = vperm.xlu1 %1394, %v808_v53  }
  0x66   : > { %865 = vperm.xlu0 %1393, %v807_v54  }
  0x69   : > { %880 = vperm.xlu1 %1394, %v810_v55  }
  0x6a   : > { %875 = vperm.xlu0 %1393, %v809_v56  }
  0x6d   : > { %890 = vperm.xlu1 %1394, %v812_v57  }
  0x6e   : > { %885 = vperm.xlu0 %1393, %v811_v58  }
  0x71   : > { %1068 = vperm.xlu1 %1394, %v1064_v59  }
  0x72   : > { %1073 = vperm.xlu0 %1393, %v1065_v60  }
  0x90   : > { %v380_v62 = vpop.permute.xlu0 %379  ;;  %v390_v63 = vpop.permute.xlu1 %389 }
  0x91   : > { %v465_v22 = vmul.f32 %v1781_v19, %v390_v63  ;;  %v463_v23 = vmul.f32 %v1781_v19, %v380_v62 }
  0x94   : > { %v385_v0 = vpop.permute.xlu0 %384  ;;  %v395_v1 = vpop.permute.xlu1 %394 }
  0x95   : > { %v466_v25 = vmul.f32 %v1781_v19, %v395_v1  ;;  %v464_v31 = vmul.f32 %v1781_v19, %v385_v0 }
  0x98   : > { %v664_v2 = vpop.permute.xlu0 %663  ;;  %v669_v3 = vpop.permute.xlu1 %668 }
  0x9c   : > { %v405_v5 = vpop.permute.xlu1 %404 }
  0x9d   : > { %v400_v4 = vpop.permute.xlu0 %399  ;;  %v468_v52 = vmul.f32 %v1781_v19, %v405_v5 }
  0x9e   : > { %v467_v43 = vmul.f32 %v1781_v19, %v400_v4 }
  0xa0   : > { %v679_v8 = vpop.permute.xlu1 %678 }
  0xa1   : > { %v674_v6 = vpop.permute.xlu0 %673 }
  0xa4   : > { %v415_v10 = vpop.permute.xlu1 %414 }
  0xa5   : > { %v410_v9 = vpop.permute.xlu0 %409  ;;  %v470_v44 = vmul.f32 %v1781_v19, %v415_v10 }
  0xa6   : > { %v469_v39 = vmul.f32 %v1781_v19, %v410_v9 }
  0xa8   : > { %v689_v12 = vpop.permute.xlu1 %688 }
  0xa9   : > { %v684_v11 = vpop.permute.xlu0 %683 }
  0xac   : > { %v1775_v14 = vpop.permute.xlu1 %424 }
  0xad   : > { %v420_v13 = vpop.permute.xlu0 %419 }
  0xae   : > { %v471_v4 = vmul.f32 %v1781_v19, %v420_v13 }
  0xb0   : > { %v699_v16 = vpop.permute.xlu1 %698 }
  0xb1   : > { %v694_v15 = vpop.permute.xlu0 %693 }
  0xb4   : > { %v435_v18 = vpop.permute.xlu1 %434 }
  0xb5   : > { %v430_v17 = vpop.permute.xlu0 %429  ;;  %v474_v10 = vmul.f32 %v1781_v19, %v435_v18 }
  0xb6   : > { %v473_v1 = vmul.f32 %v1781_v19, %v430_v17 }
  0xb8   : > { %v1785_v21 = vpop.permute.xlu1 %708 }
  0xb9   : > { %v1783_v20 = vpop.permute.xlu0 %703 }
  0xbc   : > { %v1793_v34 = vpop.permute.xlu1 %444 }
  0xbd   : > { %v1790_v28 = vpop.permute.xlu0 %439 }
  0xc0   : > { %v719_v53 = vpop.permute.xlu1 %718 }
  0xc1   : > { %v714_v45 = vpop.permute.xlu0 %713 }
  0xc4   : > { %v455_v5 = vpop.permute.xlu1 %454 }
  0xc5   : > { %v450_v63 = vpop.permute.xlu0 %449 }
  0xc8   : > { %v729_v18 = vpop.permute.xlu1 %728 }
  0xc9   : > { %v724_v13 = vpop.permute.xlu0 %723 }
  0xf3   : > { %v1284_v24 = vpop.f32.mrb[0].mxu0 }
  0xf4   : > { %v591_v26 = vadd.f32 %v1284_v24, %v465_v22  ;;  %v582_v27 = vpop.f32.mrb[1].mxu0 }
  0xf5   : > { %v583_v29 = vadd.f32 %v582_v27, %v463_v23  ;;  %v1285_v30 = vpop.f32.mrb[2].mxu0 }
  0xf6   : > { %v743_v32 = vadd.f32 %v674_v6, %v591_v26  ;;  %v594_v33 = vadd.f32 %v1285_v30, %v466_v25  ;;  %v585_v35 = vpop.f32.mrb[3].mxu0 }
  0xf7   : > { %v741_v36 = vadd.f32 %v664_v2, %v583_v29  ;;  %v586_v38 = vadd.f32 %v585_v35, %v464_v31  ;;  %v475_v35 = vmul.f32 %v1781_v19, %v1790_v28  ;;  %v739_v28 = vpop.permute.xlu1 %738 }
  0xf8   : > { %v744_v37 = vadd.f32 %v679_v8, %v594_v33  ;;  %v759_v40 = vmax.f32 %v743_v32, 0.0  ;;  %v477_v32 = vmul.f32 %v1781_v19, %v450_v63  ;;  %v1410_v63 = vld [vmem:[%s1898_s5 + $0x38] sm:$0xff]  }
  0xf9   : > { %v742_v42 = vadd.f32 %v669_v3, %v586_v38  ;;  %v757_v47 = vmax.f32 %v741_v36, 0.0 }
  0xfa   : > { %v760_v41 = vmax.f32 %v744_v37, 0.0 }
  0xfb   : > { %v1288_v46 = vpop.f32.mrb[4].mxu0  ;;  %v758_v48 = vmax.f32 %v742_v42, 0.0  ;;  %v734_v42 = vpop.permute.xlu0 %733 }
  0xfc   : > { %v607_v49 = vadd.f32 %v1288_v46, %v469_v39  ;;  %v598_v50 = vpop.f32.mrb[5].mxu0  ;;  %v790_v51 = vpack.c.bf16 %v760_v41, %v759_v40 }
  0xfd   : > { %v599_v54 = vadd.f32 %v598_v50, %v467_v43  ;;  %v1289_v55 = vpop.f32.mrb[6].mxu0  ;;  %v789_v59 = vpack.c.bf16 %v758_v48, %v757_v47 }
  0xfe   : > { %v747_v56 = vadd.f32 %v694_v15, %v607_v49  ;;  %v610_v57 = vadd.f32 %v1289_v55, %v470_v44  ;;  %v601_v58 = vpop.f32.mrb[7].mxu0 }
  0xff   : > { %v745_v60 = vadd.f32 %v684_v11, %v599_v54  ;;  %v602_v61 = vadd.f32 %v601_v58, %v468_v52  ;;  %1298 = vmatprep.subr.bf16.mxu1 %v789_v59  ;;  %v1405_v58 = vld [vmem:[%s1898_s5 + $0x10] sm:$0xff]  }
 0x100   : > { %v748_v62 = vadd.f32 %v699_v16, %v610_v57  ;;  %1299 = vmatpush3.bf16.msra.mxu1 %v789_v59  ;;  %v763_v2 = vmax.f32 %v747_v56, 0.0  ;;  %v1404_v57 = vld [vmem:[%s1898_s5 + $0x8] sm:$0xff]   ;;  %v1406_v59 = vld [vmem:[%s1898_s5 + $0x18] sm:$0xff]  }
 0x101   : > { %v746_v0 = vadd.f32 %v689_v12, %v602_v61  ;;  %1300 = vmatprep.subr.bf16.mxu1 %v790_v51  ;;  %v761_v6 = vmax.f32 %v745_v60, 0.0  ;;  %v472_v12 = vmul.f32 %v1781_v19, %v1775_v14  ;;  %v1407_v60 = vld [vmem:[%s1898_s5 + $0x20] sm:$0xff]   ;;  %v1408_v61 = vld [vmem:[%s1898_s5 + $0x28] sm:$0xff]  }
 0x102   : > { %v764_v3 = vmax.f32 %v748_v62, 0.0  ;;  %v1409_v62 = vld [vmem:[%s1898_s5 + $0x30] sm:$0xff]  }
 0x103   : > { %v762_v8 = vmax.f32 %v746_v0, 0.0  ;;  %v1292_v9 = vpop.f32.mrb[8].mxu0  ;;  %v1477_v0 = vmov 0.0  }
 0x104   : > { %v623_v11 = vadd.f32 %v1292_v9, %v473_v1  ;;  %v614_v15 = vpop.f32.mrb[9].mxu0  ;;  %v792_v16 = vpack.c.bf16 %v764_v3, %v763_v2  ;;  %1301 = vmatpush3.bf16.msra.mxu1 %v790_v51  ;;  %1330 = vmatprep.subr.bf16.mxu0 %v1477_v0  ;;  %v816_v1 = vpop.permute.xlu0 %815 }
 0x105   : > { %v615_v22 = vadd.f32 %v614_v15, %v471_v4  ;;  %v1293_v17 = vpop.f32.mrb[10].mxu0  ;;  %v791_v23 = vpack.c.bf16 %v762_v8, %v761_v6  ;;  %1346 = vmatprep.mubr.msk.bf16.mxu0 %vm1478_vm2, %v1477_v0  ;;  %v821_v2 = vpop.permute.xlu1 %820 }
 0x106   : > { %v751_v24 = vadd.f32 %v714_v45, %v623_v11  ;;  %v626_v25 = vadd.f32 %v1293_v17, %v474_v10  ;;  %v617_v26 = vpop.f32.mrb[11].mxu0 }
 0x107   : > { %v749_v27 = vadd.f32 %v1783_v20, %v615_v22  ;;  %v618_v29 = vadd.f32 %v617_v26, %v472_v12  ;;  %1302 = vmatprep.subr.bf16.mxu1 %v791_v23  ;;  %v478_v20 = vmul.f32 %v1781_v19, %v455_v5 }
 0x108   : > { %v752_v30 = vadd.f32 %v719_v53, %v626_v25  ;;  %1303 = vmatpush3.bf16.msra.mxu1 %v791_v23  ;;  %v767_v14 = vmax.f32 %v751_v24, 0.0  ;;  %v826_v3 = vpop.permute.xlu0 %825 }
 0x109   : > { %v750_v31 = vadd.f32 %v1785_v21, %v618_v29  ;;  %1304 = vmatprep.subr.bf16.mxu1 %v792_v16  ;;  %v765_v36 = vmax.f32 %v749_v27, 0.0  ;;  %v476_v21 = vmul.f32 %v1781_v19, %v1793_v34  ;;  %v831_v4 = vpop.permute.xlu1 %830 }
 0x10a   : > { %v768_v33 = vmax.f32 %v752_v30, 0.0 }
 0x10b   : > { %v766_v37 = vmax.f32 %v750_v31, 0.0  ;;  %v1296_v38 = vpop.f32.mrb[12].mxu0 }
 0x10c   : > { %v639_v39 = vadd.f32 %v1296_v38, %v477_v32  ;;  %v630_v40 = vpop.f32.mrb[13].mxu0  ;;  %v794_v41 = vpack.c.bf16 %v768_v33, %v767_v14  ;;  %1305 = vmatpush3.bf16.msra.mxu1 %v792_v16  ;;  %v836_v5 = vpop.permute.xlu0 %835 }
 0x10d   : > { %v631_v43 = vadd.f32 %v630_v40, %v475_v35  ;;  %v1297_v44 = vpop.f32.mrb[14].mxu0  ;;  %v793_v45 = vpack.c.bf16 %v766_v37, %v765_v36  ;;  %v841_v6 = vpop.permute.xlu1 %840 }
 0x10e   : > { %v755_v46 = vadd.f32 %v734_v42, %v639_v39  ;;  %v642_v47 = vadd.f32 %v1297_v44, %v478_v20  ;;  %v633_v48 = vpop.f32.mrb[15].mxu0 }
 0x10f   : > { %v753_v49 = vadd.f32 %v724_v13, %v631_v43  ;;  %v634_v50 = vadd.f32 %v633_v48, %v476_v21  ;;  %1306 = vmatprep.subr.bf16.mxu1 %v793_v45 }
 0x110   : > { %v756_v51 = vadd.f32 %v739_v28, %v642_v47  ;;  %1307 = vmatpush3.bf16.msra.mxu1 %v793_v45  ;;  %v771_v53 = vmax.f32 %v755_v46, 0.0  ;;  %v846_v8 = vpop.permute.xlu0 %845 }
 0x111   : > { %v754_v52 = vadd.f32 %v729_v18, %v634_v50  ;;  %1308 = vmatprep.subr.bf16.mxu1 %v794_v41  ;;  %v769_v55 = vmax.f32 %v753_v49, 0.0  ;;  %v851_v15 = vpop.permute.xlu1 %850 }
 0x112   : > { %v772_v54 = vmax.f32 %v756_v51, 0.0 }
 0x113   : > { %v770_v19 = vmax.f32 %v754_v52, 0.0 }
 0x114   : > { %v796_v34 = vpack.c.bf16 %v772_v54, %v771_v53  ;;  %1309 = vmatpush3.bf16.msra.mxu1 %v794_v41  ;;  %v856_v26 = vpop.permute.xlu0 %855 }
 0x115   : > { %v795_v56 = vpack.c.bf16 %v770_v19, %v769_v55  ;;  %v861_v30 = vpop.permute.xlu1 %860 }
 0x117   : > { %1310 = vmatprep.subr.bf16.mxu1 %v795_v56 }
 0x118   : > { %1311 = vmatpush3.bf16.msra.mxu1 %v795_v56  ;;  %v866_v38 = vpop.permute.xlu0 %865 }
 0x119   : > { %1312 = vmatprep.subr.bf16.mxu1 %v796_v34  ;;  %v871_v41 = vpop.permute.xlu1 %870 }
 0x11c   : > { %1313 = vmatpush3.bf16.msra.mxu1 %v796_v34  ;;  %v876_v48 = vpop.permute.xlu0 %875 }
 0x11d   : > { %v881_v52 = vpop.permute.xlu1 %880 }
 0x11f   : > { %1315 = vmatmul.mubr.bf16.vlgmr.msra.gmra.mrb[0].mxu1 %v1404_v57 }
 0x120   : > { %1318 = vmatprep.mubr.bf16.mxu1 %v1405_v58  ;;  %v886_v57 = vpop.permute.xlu0 %885 }
 0x127   : > { %1319 = vmatmul.mubr.bf16.gmra.mrb[4].mxu1 %v1406_v59 }
 0x128   : > { %1322 = vmatprep.mubr.bf16.mxu1 %v1407_v60 }
 0x12f   : > { %1323 = vmatmul.mubr.bf16.gmra.mrb[8].mxu1 %v1408_v61 }
 0x130   : > { %1326 = vmatprep.mubr.bf16.mxu1 %v1409_v62  ;;  %v891_v62 = vpop.permute.xlu1 %890 }
 0x137   : > { %1327 = vmatmul.mubr.bf16.gmra.mrb[12].mxu1 %v1410_v63 }
 0x1f2   : > { %v1316_v9 = vpop.f32.mrb[0].mxu1 }
 0x1f3   : > { %v984_v10 = vadd.f32 %v1316_v9, %v826_v3  ;;  %v975_v11 = vpop.f32.mrb[1].mxu1 }
 0x1f4   : > { %v976_v16 = vadd.f32 %v975_v11, %v816_v1  ;;  %v1317_v12 = vpop.f32.mrb[2].mxu1 }
 0x1f5   : > { %v987_v22 = vadd.f32 %v1317_v12, %v831_v4  ;;  %v978_v17 = vpop.f32.mrb[3].mxu1  ;;  %v1040_v24 = vmax.f32 %v984_v10, 0.0  ;;  %v1123_v12 = vunpack.c.l.bf16 %v1605_v7 }
 0x1f6   : > { %v979_v23 = vadd.f32 %v978_v17, %v821_v2  ;;  %v1038_v13 = vmax.f32 %v976_v16, 0.0  ;;  %v1074_v17 = vpop.permute.xlu0 %1073 }
 0x1f7   : > { %v1041_v25 = vmax.f32 %v987_v22, 0.0 }
 0x1f8   : > { %v1039_v27 = vmax.f32 %v979_v23, 0.0 }
 0x1f9   : > { %v1057_v29 = vpack.c.bf16 %v1041_v25, %v1040_v24 }
 0x1fa   : > { %v1056_v18 = vpack.c.bf16 %v1039_v27, %v1038_v13  ;;  %v1320_v31 = vpop.f32.mrb[4].mxu1 }
 0x1fb   : > { %v1000_v32 = vadd.f32 %v1320_v31, %v846_v8  ;;  %v991_v14 = vpop.f32.mrb[5].mxu1 }
 0x1fc   : > { %v992_v33 = vadd.f32 %v991_v14, %v836_v5  ;;  %v1321_v35 = vpop.f32.mrb[6].mxu1  ;;  %1331 = vmatpush3.bf16.msra.mxu0 %v1056_v18 }
 0x1fd   : > { %v1003_v36 = vadd.f32 %v1321_v35, %v851_v15  ;;  %v994_v37 = vpop.f32.mrb[7].mxu1  ;;  %1332 = vmatprep.subr.bf16.mxu0 %v1477_v0  ;;  %v1044_v39 = vmax.f32 %v1000_v32, 0.0  ;;  %v1411_v15 = vld [vmem:[%s1900_s7] sm:$0xff]  }
 0x1fe   : > { %v995_v20 = vadd.f32 %v994_v37, %v841_v6  ;;  %v1042_v21 = vmax.f32 %v992_v33, 0.0 }
 0x1ff   : > { %v1045_v40 = vmax.f32 %v1003_v36, 0.0 }
 0x200   : > { %v1043_v42 = vmax.f32 %v995_v20, 0.0  ;;  %1333 = vmatpush3.bf16.msra.mxu0 %v1057_v29 }
 0x201   : > { %v1059_v43 = vpack.c.bf16 %v1045_v40, %v1044_v39  ;;  %1334 = vmatprep.subr.bf16.mxu0 %v1477_v0 }
 0x202   : > { %v1058_v44 = vpack.c.bf16 %v1043_v42, %v1042_v21  ;;  %v1324_v45 = vpop.f32.mrb[8].mxu1 }
 0x203   : > { %v1016_v46 = vadd.f32 %v1324_v45, %v866_v38  ;;  %v1007_v47 = vpop.f32.mrb[9].mxu1 }
 0x204   : > { %v1008_v28 = vadd.f32 %v1007_v47, %v856_v26  ;;  %v1325_v49 = vpop.f32.mrb[10].mxu1  ;;  %1335 = vmatpush3.bf16.msra.mxu0 %v1058_v44  ;;  %v1069_v26 = vpop.permute.xlu1 %1068 }
 0x205   : > { %v1019_v50 = vadd.f32 %v1325_v49, %v871_v41  ;;  %v1010_v51 = vpop.f32.mrb[11].mxu1  ;;  %1336 = vmatprep.subr.bf16.mxu0 %v1477_v0  ;;  %v1048_v54 = vmax.f32 %v1016_v46, 0.0 }
 0x206   : > { %v1011_v53 = vadd.f32 %v1010_v51, %v861_v30  ;;  %v1046_v19 = vmax.f32 %v1008_v28, 0.0 }
 0x207   : > { %v1049_v55 = vmax.f32 %v1019_v50, 0.0 }
 0x208   : > { %v1047_v34 = vmax.f32 %v1011_v53, 0.0  ;;  %1337 = vmatpush3.bf16.msra.mxu0 %v1059_v43 }
 0x209   : > { %v1061_v56 = vpack.c.bf16 %v1049_v55, %v1048_v54  ;;  %1338 = vmatprep.subr.bf16.mxu0 %v1477_v0 }
 0x20a   : > { %v1060_v58 = vpack.c.bf16 %v1047_v34, %v1046_v19  ;;  %v1328_v59 = vpop.f32.mrb[12].mxu1 }
 0x20b   : > { %v1032_v60 = vadd.f32 %v1328_v59, %v886_v57  ;;  %v1023_v61 = vpop.f32.mrb[13].mxu1 }
 0x20c   : > { %v1024_v63 = vadd.f32 %v1023_v61, %v876_v48  ;;  %v1329_v1 = vpop.f32.mrb[14].mxu1  ;;  %1339 = vmatpush3.bf16.msra.mxu0 %v1060_v58 }
 0x20d   : > { %v1035_v2 = vadd.f32 %v1329_v1, %v891_v62  ;;  %v1026_v3 = vpop.f32.mrb[15].mxu1  ;;  %1340 = vmatprep.subr.bf16.mxu0 %v1477_v0  ;;  %v1052_v5 = vmax.f32 %v1032_v60, 0.0 }
 0x20e   : > { %v1027_v4 = vadd.f32 %v1026_v3, %v881_v52  ;;  %v1050_v8 = vmax.f32 %v1024_v63, 0.0 }
 0x20f   : > { %v1053_v6 = vmax.f32 %v1035_v2, 0.0 }
 0x210   : > { %v1051_v9 = vmax.f32 %v1027_v4, 0.0  ;;  %1341 = vmatpush3.bf16.msra.mxu0 %v1061_v56 }
 0x211   : > { %v1063_v10 = vpack.c.bf16 %v1053_v6, %v1052_v5  ;;  %1342 = vmatprep.subr.bf16.mxu0 %v1477_v0 }
 0x212   : > { %v1062_v11 = vpack.c.bf16 %v1051_v9, %v1050_v8 }
 0x214   : > { %1343 = vmatpush3.bf16.msra.mxu0 %v1062_v11 }
 0x215   : > { %1344 = vmatprep.subr.bf16.mxu0 %v1477_v0 }
 0x218   : > { %1345 = vmatpush3.bf16.msra.mxu0 %v1063_v10 }
 0x21b   : > { %1347 = vmatmul.mubr.bf16.vlgmr.msra.gmra.mrb[16].mxu0 %v1411_v15 }
 0x2ee   : > { %v1116_v16 = vpop.f32.mrb[16].mxu0 }
 0x2ef   : > { %v1348_v22 = vpop.f32.mrb[17].mxu0  ;;  %v1117_v0 = vadd.f32 %v1116_v16, %v1069_v26 }
 0x2f0   : > { %v1119_v23 = vpop.f32.mrb[18].mxu0 }
 0x2f1   : > { %v1120_v24 = vadd.f32 %v1119_v23, %v1074_v17  ;;  %v1349_v25 = vpop.f32.mrb[19].mxu0 }
 0x2f3   : > { %v1124_v13 = vmul.f32 %v1123_v12, %v1120_v24 }
 0x2f5   : > { %v1125_v27 = vadd.f32 %v1124_v13, %v1117_v0 }
 0x2f7   : > { %v1126_v29 = vpack.c.bf16 %v1125_v27, %v1125_v27 }
 0x2f9   : > { %1127 = vst [vmem:[%s334_s22] sm:$0xf] %v1126_v29 }
 0x2fa   : > { %1425 = shalt.err (!%p1422_p3)
}
 0x2fb   : > { %s1426_s16 = scalar_lea.hbm %s1851_s26, 64  ;;  %s1430_s21 = scalar_lea.hbm %s1902_s9, 128 }
 0x2fc   : > { %p1427_p4 = scmp.ne.s32.totalorder %s1851_s26, %s1426_s16  ;;  %p1431_p9 = scmp.lt.u32.totalorder %s1851_s26, %s1902_s9 }
 0x2fd   : > { %p1432_p10 = scmp.lt.u32.totalorder %s1430_s21, %s1426_s16  ;;  %p1434_p12 = scmp.lt.u32.totalorder %s1426_s16, %s1851_s26 }
 0x2fe   : > { %p1428_p7 = pnand %p1427_p4, %p1568_p5 }
 0x2ff   : > { %p1433_p11 = por %p1432_p10, %p1431_p9 }
 0x300   : > { %p1429_p8 = pneg %p1428_p7 }
 0x301   : > { %p1435_p13 = por %p1434_p12, %p1433_p11 }
 0x303   : > { %p1436_p0 = pnand %p1435_p13, %p1429_p8 }
 0x305   : > { %1439 = shalt.err (!%p1436_p0)
}
 0x306   : > { %1351 = dma.vmem_to_hbm [thread:$0]  (%p1568_p5), %s1853_s23, 64, %s1851_s26, %s1129_s28  }
 0x307 PF: > { %p1357_p1 = scmp.ge.s32.totalorder %s1474_s12, 2  ;;  %s1154_s25 = sand.u32 1, %s1462_s30  }
 0x308   : > { %s1155_s29 = scalar_lea.sflag [#allocation3], %s1154_s25 }
 0x309   : > { %p1354_p2 = pnand %p1357_p1, %p1572_p6 }
 0x30b   : > { %1457 = dma.done.wait (!%p1354_p2), %s1155_s29, 64  }
 0x30c   : > { %1459 = vsyncadd (!%p1354_p2), %s1155_s29, 4294967232  ;;  %p19_p3 = scmp.ge.s32.totalorder %s1555_s15, 4   ;;  %s1907_s30 = smov %s1466_s10 }
 0x30d   : > { %s1908_s10 = smov %s1470_s11  ;;  %s1909_s11 = smov %s1566_s18 }
 0x30e   : > { %s1910_s12 = smov %s1555_s15  ;;  %21 = sbr.rel (!%p19_p3) target bundleno = 5 (0x5), region = 94 }
 0x315   :  { %1160 = vsyncpa [#allocation3], 1 }
 0x316   :  { %1162 = vsyncpa [#allocation3 + $0x1], 1 }

</bundles_post_ra>
